<compile_context>
chip_gen: v7x
topology: tpu7x:2x2x1
jax: 0.10.0
libtpu: 0.0.40
codegen_flags: <defaults>
</compile_context>

<pallas_src>
import functools

import jax
import jax.numpy as jnp
from jax import lax
from jax.experimental import pallas as pl
from jax.experimental.pallas import tpu as pltpu

ACTION_DIM = 2
STATE_DIM = 2 * 2 + 3 * 2 + 1   # 11
HEAD_DIM = 2 * ACTION_DIM       # fused mean || std head (4 rows)

_PREC = lax.Precision.HIGHEST   # full-f32 matmuls in kernel and reference


def _round_up(n, m):
    return ((n + m - 1) // m) * m


def _leaky_relu(x, slope=0.1):
    return jnp.where(x > 0, x, slope * x)


def policy_kernel(x_ref,
                  w1_ref, b1_ref,
                  w2_ref, b2_ref,
                  w4_ref, b4_ref,
                  w5_ref, b5_ref,
                  wh_ref, bh_ref,
                  scale_ref, offset_ref,
                  out_ref):
    # Feature-major layout: x is [STATE_DIM, tile_b]; batch lives on the lanes.
    x = x_ref[...]

    # 4 hidden layers, leaky_relu(0.1).  Weights are [out, in] -> W @ X.
    h = _leaky_relu(jnp.dot(w1_ref[...], x, precision=_PREC,
                            preferred_element_type=jnp.float32) + b1_ref[...])
    h = _leaky_relu(jnp.dot(w2_ref[...], h, precision=_PREC,
                            preferred_element_type=jnp.float32) + b2_ref[...])
    h = _leaky_relu(jnp.dot(w4_ref[...], h, precision=_PREC,
                            preferred_element_type=jnp.float32) + b4_ref[...])
    h = _leaky_relu(jnp.dot(w5_ref[...], h, precision=_PREC,
                            preferred_element_type=jnp.float32) + b5_ref[...])

    # Fused head: logits = [m ; s], shape [HEAD_DIM, tile_b] (one matmul).
    logits = jnp.dot(wh_ref[...], h, precision=_PREC,
                     preferred_element_type=jnp.float32) + bh_ref[...]

    # Exact sigmoid (exp on EUP; the divide is not on the critical path).
    sig = 1.0 / (1.0 + jnp.exp(-logits))

    # Per-row scale / offset passed as (HEAD_DIM, 1) operands:
    #   rows 0..1: mean = [280, 40] * sig + [120, 0]
    #   rows 2..3: std  = [20, 10]  * sig
    out_ref[...] = scale_ref[...] * sig + offset_ref[...]


@functools.partial(jax.jit, static_argnames=("tile_b",))
def neural_network_forward(x, params, tile_b=4096):
    """x: [B, STATE_DIM] float32 -> (mean, std), each [B, ACTION_DIM]."""
    B = x.shape[0]

    # Batch sits on the lane axis -> tile must be a multiple of 128.
    # Cap it so large batches split into >= 2 tiles (both v7x TensorCores).
    tb = max(128, min(_round_up(tile_b, 128), _round_up(pl.cdiv(B, 2), 128)))
    grid = (pl.cdiv(B, tb),)   # no pad-to-tile-multiple: ragged tail is masked

    xt = x.T  # [STATE_DIM, B] -- single cheap layout op at the boundary

    scale = jnp.array([[400.0 - 120.0], [40.0], [20.0], [10.0]], dtype=jnp.float32)
    offset = jnp.array([[120.0], [0.0], [0.0], [0.0]], dtype=jnp.float32)

    args = (
        xt,
        params["w1"], params["b1"],
        params["w2"], params["b2"],
        params["w4"], params["b4"],
        params["w5"], params["b5"],
        params["wh"], params["bh"],
        scale, offset,
    )

    # x tile marches along the batch (lane) axis; weights/biases/consts resident.
    in_specs = [pl.BlockSpec((STATE_DIM, tb), lambda i: (0, i))]
    for a in args[1:]:
        in_specs.append(pl.BlockSpec(a.shape, lambda i: (0, 0)))

    out = pl.pallas_call(
        policy_kernel,
        grid=grid,
        in_specs=in_specs,
        out_specs=pl.BlockSpec((HEAD_DIM, tb), lambda i: (0, i)),
        out_shape=jax.ShapeDtypeStruct((HEAD_DIM, B), jnp.float32),
        compiler_params=pltpu.CompilerParams(
            dimension_semantics=("parallel",)),   # shards across TCs on v7x
    )(*args)

    mean = out[:ACTION_DIM, :].T
    std = out[ACTION_DIM:, :].T
    return mean, std


def init_params(key, hidden_dim):
    """Deterministic PyTorch nn.Linear-style init; weights in [out, in] layout."""
    dims = [
        ("1", STATE_DIM, hidden_dim),
        ("2", hidden_dim, hidden_dim),
        ("4", hidden_dim, hidden_dim),
        ("5", hidden_dim, hidden_dim),
        ("3", hidden_dim, ACTION_DIM),
        ("3p", hidden_dim, ACTION_DIM),
    ]
    params = {}
    for name, fan_in, fan_out in dims:
        key, kw, kb = jax.random.split(key, 3)
        bound = 1.0 / float(fan_in) ** 0.5
        params["w" + name] = jax.random.uniform(
            kw, (fan_out, fan_in), jnp.float32, -bound, bound)
        params["b" + name] = jax.random.uniform(
            kb, (fan_out, 1), jnp.float32, -bound, bound)
    # Fused head: mean rows then std rows -> one [HEAD_DIM, hidden] matmul.
    params["wh"] = jnp.concatenate([params["w3"], params["w3p"]], axis=0)
    params["bh"] = jnp.concatenate([params["b3"], params["b3p"]], axis=0)
    return params


def reference_forward(x, p):
    def lin(h, w, b):
        return jnp.dot(h, w.T, precision=_PREC) + b.T

    h = jax.nn.leaky_relu(lin(x, p["w1"], p["b1"]), 0.1)
    h = jax.nn.leaky_relu(lin(h, p["w2"], p["b2"]), 0.1)
    h = jax.nn.leaky_relu(lin(h, p["w4"], p["b4"]), 0.1)
    h = jax.nn.leaky_relu(lin(h, p["w5"], p["b5"]), 0.1)
    m = lin(h, p["w3"], p["b3"])
    s = lin(h, p["w3p"], p["b3p"])
    mean = jnp.array([400.0 - 120.0, 40.0]) * jax.nn.sigmoid(m) + jnp.array([120.0, 0.0])
    std = jnp.array([20.0, 10.0]) * jax.nn.sigmoid(s)
    return mean, std


if __name__ == "__main__":
    hidden_dim = 32
    batch = 300   # deliberately NOT a multiple of 8/128: exercises the masked tail tile

    key = jax.random.PRNGKey(0)
    key, kx = jax.random.split(key)
    x = jax.random.normal(kx, (batch, STATE_DIM), jnp.float32)
    params = init_params(key, hidden_dim)

    # tile_b=128 -> 3-step batch grid (2 full tiles + 1 ragged/masked tail).
    mean, std = neural_network_forward(x, params, tile_b=128)
    jax.block_until_ready((mean, std))

    mean_ref, std_ref = reference_forward(x, params)
    assert mean.shape == (batch, ACTION_DIM) and std.shape == (batch, ACTION_DIM)
    assert jnp.allclose(mean, mean_ref, atol=1e-2, rtol=1e-3), (
        float(jnp.max(jnp.abs(mean - mean_ref))))
    assert jnp.allclose(std, std_ref, atol=1e-2, rtol=1e-3), (
        float(jnp.max(jnp.abs(std - std_ref))))

    # Also exercise the production default (large-tile) path.
    mean2, std2 = neural_network_forward(x, params)
    jax.block_until_ready((mean2, std2))
    assert jnp.allclose(mean2, mean_ref, atol=1e-2, rtol=1e-3)
    assert jnp.allclose(std2, std_ref, atol=1e-2, rtol=1e-3)

    print("KERNEL_OK")
</pallas_src>

<mosaic_0001>
module attributes {stable_mosaic.version = 11 : i64} {
  func.func @policy_kernel(%arg0: i32, %arg1: memref<11x128xf32, #tpu.memory_space<vmem>>, %arg2: memref<32x11xf32, #tpu.memory_space<vmem>>, %arg3: memref<32x1xf32, #tpu.memory_space<vmem>>, %arg4: memref<32x32xf32, #tpu.memory_space<vmem>>, %arg5: memref<32x1xf32, #tpu.memory_space<vmem>>, %arg6: memref<32x32xf32, #tpu.memory_space<vmem>>, %arg7: memref<32x1xf32, #tpu.memory_space<vmem>>, %arg8: memref<32x32xf32, #tpu.memory_space<vmem>>, %arg9: memref<32x1xf32, #tpu.memory_space<vmem>>, %arg10: memref<4x32xf32, #tpu.memory_space<vmem>>, %arg11: memref<4x1xf32, #tpu.memory_space<vmem>>, %arg12: memref<4x1xf32, #tpu.memory_space<vmem>>, %arg13: memref<4x1xf32, #tpu.memory_space<vmem>>, %arg14: memref<4x128xf32, #tpu.memory_space<vmem>>) attributes {dimension_semantics = [#tpu.dimension_semantics<parallel>], iteration_bounds = array<i64: 3>, scalar_prefetch = 0 : i64, scratch_operands = 0 : i64, tpu.core_type = #tpu.core_type<tc>, window_params = [{transform_indices = @transform_0, window_bounds = array<i64: 11, 128>}, {pipeline_mode = #tpu.pipeline_mode<synchronous>, transform_indices = @transform_1, window_bounds = array<i64: 32, 11>}, {pipeline_mode = #tpu.pipeline_mode<synchronous>, transform_indices = @transform_2, window_bounds = array<i64: 32, 1>}, {pipeline_mode = #tpu.pipeline_mode<synchronous>, transform_indices = @transform_3, window_bounds = array<i64: 32, 32>}, {pipeline_mode = #tpu.pipeline_mode<synchronous>, transform_indices = @transform_4, window_bounds = array<i64: 32, 1>}, {pipeline_mode = #tpu.pipeline_mode<synchronous>, transform_indices = @transform_5, window_bounds = array<i64: 32, 32>}, {pipeline_mode = #tpu.pipeline_mode<synchronous>, transform_indices = @transform_6, window_bounds = array<i64: 32, 1>}, {pipeline_mode = #tpu.pipeline_mode<synchronous>, transform_indices = @transform_7, window_bounds = array<i64: 32, 32>}, {pipeline_mode = #tpu.pipeline_mode<synchronous>, transform_indices = @transform_8, window_bounds = array<i64: 32, 1>}, {pipeline_mode = #tpu.pipeline_mode<synchronous>, transform_indices = @transform_9, window_bounds = array<i64: 4, 32>}, {pipeline_mode = #tpu.pipeline_mode<synchronous>, transform_indices = @transform_10, window_bounds = array<i64: 4, 1>}, {pipeline_mode = #tpu.pipeline_mode<synchronous>, transform_indices = @transform_11, window_bounds = array<i64: 4, 1>}, {pipeline_mode = #tpu.pipeline_mode<synchronous>, transform_indices = @transform_12, window_bounds = array<i64: 4, 1>}, {transform_indices = @transform_13, window_bounds = array<i64: 4, 128>}]} {
    %c0 = arith.constant 0 : index
    %c0_0 = arith.constant 0 : index
    %0 = vector.load %arg1[%c0, %c0_0] : memref<11x128xf32, #tpu.memory_space<vmem>>, vector<11x128xf32>
    %c0_1 = arith.constant 0 : index
    %c0_2 = arith.constant 0 : index
    %1 = vector.load %arg2[%c0_1, %c0_2] : memref<32x11xf32, #tpu.memory_space<vmem>>, vector<32x11xf32>
    %cst = arith.constant dense<0.000000e+00> : vector<32x128xf32>
    %2 = tpu.matmul %1, %0, %cst {dimension_numbers = #tpu.dot_dimension_numbers<[1], [0], [0], [1], [0, 0, 1, 1], [], []>, precision = #tpu.contract_precision<fp32>} : vector<32x11xf32>, vector<11x128xf32>, vector<32x128xf32> -> vector<32x128xf32>
    %c0_3 = arith.constant 0 : index
    %c0_4 = arith.constant 0 : index
    %3 = vector.load %arg3[%c0_3, %c0_4] : memref<32x1xf32, #tpu.memory_space<vmem>>, vector<32x1xf32>
    %4 = vector.broadcast %3 : vector<32x1xf32> to vector<32x128xf32>
    %5 = arith.addf %2, %4 : vector<32x128xf32>
    %cst_5 = arith.constant 0.000000e+00 : f32
    %6 = vector.broadcast %cst_5 : f32 to vector<32x128xf32>
    %7 = arith.cmpf ogt, %5, %6 : vector<32x128xf32>
    %cst_6 = arith.constant 1.000000e-01 : f32
    %8 = vector.broadcast %cst_6 : f32 to vector<32x128xf32>
    %9 = arith.mulf %8, %5 : vector<32x128xf32>
    %10 = arith.select %7, %5, %9 : vector<32x128xi1>, vector<32x128xf32>
    %c0_7 = arith.constant 0 : index
    %c0_8 = arith.constant 0 : index
    %11 = vector.load %arg4[%c0_7, %c0_8] : memref<32x32xf32, #tpu.memory_space<vmem>>, vector<32x32xf32>
    %cst_9 = arith.constant dense<0.000000e+00> : vector<32x128xf32>
    %12 = tpu.matmul %11, %10, %cst_9 {dimension_numbers = #tpu.dot_dimension_numbers<[1], [0], [0], [1], [0, 0, 1, 1], [], []>, precision = #tpu.contract_precision<fp32>} : vector<32x32xf32>, vector<32x128xf32>, vector<32x128xf32> -> vector<32x128xf32>
    %c0_10 = arith.constant 0 : index
    %c0_11 = arith.constant 0 : index
    %13 = vector.load %arg5[%c0_10, %c0_11] : memref<32x1xf32, #tpu.memory_space<vmem>>, vector<32x1xf32>
    %14 = vector.broadcast %13 : vector<32x1xf32> to vector<32x128xf32>
    %15 = arith.addf %12, %14 : vector<32x128xf32>
    %cst_12 = arith.constant 0.000000e+00 : f32
    %16 = vector.broadcast %cst_12 : f32 to vector<32x128xf32>
    %17 = arith.cmpf ogt, %15, %16 : vector<32x128xf32>
    %cst_13 = arith.constant 1.000000e-01 : f32
    %18 = vector.broadcast %cst_13 : f32 to vector<32x128xf32>
    %19 = arith.mulf %18, %15 : vector<32x128xf32>
    %20 = arith.select %17, %15, %19 : vector<32x128xi1>, vector<32x128xf32>
    %c0_14 = arith.constant 0 : index
    %c0_15 = arith.constant 0 : index
    %21 = vector.load %arg6[%c0_14, %c0_15] : memref<32x32xf32, #tpu.memory_space<vmem>>, vector<32x32xf32>
    %cst_16 = arith.constant dense<0.000000e+00> : vector<32x128xf32>
    %22 = tpu.matmul %21, %20, %cst_16 {dimension_numbers = #tpu.dot_dimension_numbers<[1], [0], [0], [1], [0, 0, 1, 1], [], []>, precision = #tpu.contract_precision<fp32>} : vector<32x32xf32>, vector<32x128xf32>, vector<32x128xf32> -> vector<32x128xf32>
    %c0_17 = arith.constant 0 : index
    %c0_18 = arith.constant 0 : index
    %23 = vector.load %arg7[%c0_17, %c0_18] : memref<32x1xf32, #tpu.memory_space<vmem>>, vector<32x1xf32>
    %24 = vector.broadcast %23 : vector<32x1xf32> to vector<32x128xf32>
    %25 = arith.addf %22, %24 : vector<32x128xf32>
    %cst_19 = arith.constant 0.000000e+00 : f32
    %26 = vector.broadcast %cst_19 : f32 to vector<32x128xf32>
    %27 = arith.cmpf ogt, %25, %26 : vector<32x128xf32>
    %cst_20 = arith.constant 1.000000e-01 : f32
    %28 = vector.broadcast %cst_20 : f32 to vector<32x128xf32>
    %29 = arith.mulf %28, %25 : vector<32x128xf32>
    %30 = arith.select %27, %25, %29 : vector<32x128xi1>, vector<32x128xf32>
    %c0_21 = arith.constant 0 : index
    %c0_22 = arith.constant 0 : index
    %31 = vector.load %arg8[%c0_21, %c0_22] : memref<32x32xf32, #tpu.memory_space<vmem>>, vector<32x32xf32>
    %cst_23 = arith.constant dense<0.000000e+00> : vector<32x128xf32>
    %32 = tpu.matmul %31, %30, %cst_23 {dimension_numbers = #tpu.dot_dimension_numbers<[1], [0], [0], [1], [0, 0, 1, 1], [], []>, precision = #tpu.contract_precision<fp32>} : vector<32x32xf32>, vector<32x128xf32>, vector<32x128xf32> -> vector<32x128xf32>
    %c0_24 = arith.constant 0 : index
    %c0_25 = arith.constant 0 : index
    %33 = vector.load %arg9[%c0_24, %c0_25] : memref<32x1xf32, #tpu.memory_space<vmem>>, vector<32x1xf32>
    %34 = vector.broadcast %33 : vector<32x1xf32> to vector<32x128xf32>
    %35 = arith.addf %32, %34 : vector<32x128xf32>
    %cst_26 = arith.constant 0.000000e+00 : f32
    %36 = vector.broadcast %cst_26 : f32 to vector<32x128xf32>
    %37 = arith.cmpf ogt, %35, %36 : vector<32x128xf32>
    %cst_27 = arith.constant 1.000000e-01 : f32
    %38 = vector.broadcast %cst_27 : f32 to vector<32x128xf32>
    %39 = arith.mulf %38, %35 : vector<32x128xf32>
    %40 = arith.select %37, %35, %39 : vector<32x128xi1>, vector<32x128xf32>
    %c0_28 = arith.constant 0 : index
    %c0_29 = arith.constant 0 : index
    %41 = vector.load %arg10[%c0_28, %c0_29] : memref<4x32xf32, #tpu.memory_space<vmem>>, vector<4x32xf32>
    %cst_30 = arith.constant dense<0.000000e+00> : vector<4x128xf32>
    %42 = tpu.matmul %41, %40, %cst_30 {dimension_numbers = #tpu.dot_dimension_numbers<[1], [0], [0], [1], [0, 0, 1, 1], [], []>, precision = #tpu.contract_precision<fp32>} : vector<4x32xf32>, vector<32x128xf32>, vector<4x128xf32> -> vector<4x128xf32>
    %c0_31 = arith.constant 0 : index
    %c0_32 = arith.constant 0 : index
    %43 = vector.load %arg11[%c0_31, %c0_32] : memref<4x1xf32, #tpu.memory_space<vmem>>, vector<4x1xf32>
    %44 = vector.broadcast %43 : vector<4x1xf32> to vector<4x128xf32>
    %45 = arith.addf %42, %44 : vector<4x128xf32>
    %cst_33 = arith.constant 0.000000e+00 : f32
    %46 = vector.broadcast %cst_33 : f32 to vector<4x128xf32>
    %47 = arith.subf %46, %45 : vector<4x128xf32>
    %48 = math.exp %47 : vector<4x128xf32>
    %cst_34 = arith.constant 1.000000e+00 : f32
    %49 = vector.broadcast %cst_34 : f32 to vector<4x128xf32>
    %50 = arith.addf %49, %48 : vector<4x128xf32>
    %cst_35 = arith.constant 1.000000e+00 : f32
    %51 = vector.broadcast %cst_35 : f32 to vector<4x128xf32>
    %52 = arith.divf %51, %50 : vector<4x128xf32>
    %c0_36 = arith.constant 0 : index
    %c0_37 = arith.constant 0 : index
    %53 = vector.load %arg12[%c0_36, %c0_37] : memref<4x1xf32, #tpu.memory_space<vmem>>, vector<4x1xf32>
    %54 = vector.broadcast %53 : vector<4x1xf32> to vector<4x128xf32>
    %55 = arith.mulf %54, %52 : vector<4x128xf32>
    %c0_38 = arith.constant 0 : index
    %c0_39 = arith.constant 0 : index
    %56 = vector.load %arg13[%c0_38, %c0_39] : memref<4x1xf32, #tpu.memory_space<vmem>>, vector<4x1xf32>
    %57 = vector.broadcast %56 : vector<4x1xf32> to vector<4x128xf32>
    %58 = arith.addf %55, %57 : vector<4x128xf32>
    %c0_40 = arith.constant 0 : index
    %c0_41 = arith.constant 0 : index
    %59 = vector.load %arg14[%c0_40, %c0_41] : memref<4x128xf32, #tpu.memory_space<vmem>>, vector<4x128xf32>
    tpu.vector_store %arg14[%c0_40, %c0_41], %58 {strides = array<i32>} : memref<4x128xf32, #tpu.memory_space<vmem>>, vector<4x128xf32>,
    return
  }
  func.func @transform_0(%arg0: i32) -> (i32, i32) {
    %c0_i32 = arith.constant 0 : i32
    %c0_i32_0 = arith.constant 0 : i32
    return %c0_i32, %arg0 : i32, i32
  }
  func.func @transform_1(%arg0: i32) -> (i32, i32) {
    %c0_i32 = arith.constant 0 : i32
    %c0_i32_0 = arith.constant 0 : i32
    %c0_i32_1 = arith.constant 0 : i32
    return %c0_i32, %c0_i32_0 : i32, i32
  }
  func.func @transform_2(%arg0: i32) -> (i32, i32) {
    %c0_i32 = arith.constant 0 : i32
    %c0_i32_0 = arith.constant 0 : i32
    %c0_i32_1 = arith.constant 0 : i32
    return %c0_i32, %c0_i32_0 : i32, i32
  }
  func.func @transform_3(%arg0: i32) -> (i32, i32) {
    %c0_i32 = arith.constant 0 : i32
    %c0_i32_0 = arith.constant 0 : i32
    %c0_i32_1 = arith.constant 0 : i32
    return %c0_i32, %c0_i32_0 : i32, i32
  }
  func.func @transform_4(%arg0: i32) -> (i32, i32) {
    %c0_i32 = arith.constant 0 : i32
    %c0_i32_0 = arith.constant 0 : i32
    %c0_i32_1 = arith.constant 0 : i32
    return %c0_i32, %c0_i32_0 : i32, i32
  }
  func.func @transform_5(%arg0: i32) -> (i32, i32) {
    %c0_i32 = arith.constant 0 : i32
    %c0_i32_0 = arith.constant 0 : i32
    %c0_i32_1 = arith.constant 0 : i32
    return %c0_i32, %c0_i32_0 : i32, i32
  }
  func.func @transform_6(%arg0: i32) -> (i32, i32) {
    %c0_i32 = arith.constant 0 : i32
    %c0_i32_0 = arith.constant 0 : i32
    %c0_i32_1 = arith.constant 0 : i32
    return %c0_i32, %c0_i32_0 : i32, i32
  }
  func.func @transform_7(%arg0: i32) -> (i32, i32) {
    %c0_i32 = arith.constant 0 : i32
    %c0_i32_0 = arith.constant 0 : i32
    %c0_i32_1 = arith.constant 0 : i32
    return %c0_i32, %c0_i32_0 : i32, i32
  }
  func.func @transform_8(%arg0: i32) -> (i32, i32) {
    %c0_i32 = arith.constant 0 : i32
    %c0_i32_0 = arith.constant 0 : i32
    %c0_i32_1 = arith.constant 0 : i32
    return %c0_i32, %c0_i32_0 : i32, i32
  }
  func.func @transform_9(%arg0: i32) -> (i32, i32) {
    %c0_i32 = arith.constant 0 : i32
    %c0_i32_0 = arith.constant 0 : i32
    %c0_i32_1 = arith.constant 0 : i32
    return %c0_i32, %c0_i32_0 : i32, i32
  }
  func.func @transform_10(%arg0: i32) -> (i32, i32) {
    %c0_i32 = arith.constant 0 : i32
    %c0_i32_0 = arith.constant 0 : i32
    %c0_i32_1 = arith.constant 0 : i32
    return %c0_i32, %c0_i32_0 : i32, i32
  }
  func.func @transform_11(%arg0: i32) -> (i32, i32) {
    %c0_i32 = arith.constant 0 : i32
    %c0_i32_0 = arith.constant 0 : i32
    %c0_i32_1 = arith.constant 0 : i32
    return %c0_i32, %c0_i32_0 : i32, i32
  }
  func.func @transform_12(%arg0: i32) -> (i32, i32) {
    %c0_i32 = arith.constant 0 : i32
    %c0_i32_0 = arith.constant 0 : i32
    %c0_i32_1 = arith.constant 0 : i32
    return %c0_i32, %c0_i32_0 : i32, i32
  }
  func.func @transform_13(%arg0: i32) -> (i32, i32) {
    %c0_i32 = arith.constant 0 : i32
    %c0_i32_0 = arith.constant 0 : i32
    return %c0_i32, %arg0 : i32, i32
  }
}

</mosaic_0001>

<bundles_post_ra>
// kernel: neural_network_forward.1
= control target key start
LH: loop header
LB: loop body
LE: loop exit
PB: predicated region body
PF: predicated region fallthrough
CT: control target
= control target key end

     0   :  { %s4739_s25 = smov 0   ;;  %s4741_s26 = smov 0   ;;  %s5189_s0 = inlined_call_operand.vmem [shape: f32[11,300], index: 0, kind: input, shape index: {}]   ;;  %s5190_s1 = inlined_call_operand.vmem [shape: f32[32,11], index: 1, kind: input, shape index: {}]   ;;  %s5191_s2 = inlined_call_operand.vmem [shape: f32[32,1], index: 2, kind: input, shape index: {}]   ;;  %s5192_s3 = inlined_call_operand.vmem [shape: f32[32,32], index: 3, kind: input, shape index: {}]   ;;  %s5193_s4 = inlined_call_operand.vmem [shape: f32[32,1], index: 4, kind: input, shape index: {}]   ;;  %s5194_s5 = inlined_call_operand.vmem [shape: f32[32,32], index: 5, kind: input, shape index: {}]   ;;  %s5195_s6 = inlined_call_operand.vmem [shape: f32[32,1], index: 6, kind: input, shape index: {}]   ;;  %s5196_s7 = inlined_call_operand.vmem [shape: f32[32,32], index: 7, kind: input, shape index: {}]   ;;  %s5197_s8 = inlined_call_operand.vmem [shape: f32[32,1], index: 8, kind: input, shape index: {}]   ;;  %s5198_s9 = inlined_call_operand.vmem [shape: f32[4,32], index: 9, kind: input, shape index: {}]   ;;  %s5199_s10 = inlined_call_operand.vmem [shape: f32[4,1], index: 10, kind: input, shape index: {}]   ;;  %s5200_s11 = inlined_call_operand.vmem [shape: f32[4,1], index: 11, kind: input, shape index: {}]   ;;  %s5201_s12 = inlined_call_operand.vmem [shape: f32[4,1], index: 12, kind: input, shape index: {}]   ;;  %s5202_s13 = inlined_call_operand.vmem [shape: f32[4,300], index: 13, kind: output, shape index: {}]  }
   0x1   :  { %s4743_s27 = smov 0  }
   0x2 LB: > { %s3698_s28 = sadd.s32 4294967295, %s4663_s27   ;;  %s4756_s29 = sadd.s32 1, %s4663_s27   ;;  %s4663_s27 = sphi %s4743_s27, %s5205_s27   ;;  %s4659_s26 = sphi %s4741_s26, %s5204_s26   ;;  %s4655_s25 = sphi %s4739_s25, %s5203_s25  }
   0x3   : > { %s27_s30 = ssub.s32 %s4663_s27, %s4756_s29  ;;  %s30_s14 = sadd.s32 1, %s4659_s26 }
   0x4   : > { %p28_p0 = scmp.eq.s32.totalorder %s27_s30, 0  ;;  %p37_p1 = scmp.ne.s32.totalorder %s4659_s26, %s4655_s25 }
   0x5   : > { %p38_p2 = scmp.eq.s32.totalorder %s4663_s27, 0  ;;  %p3701_p4 = scmp.ge.s32.totalorder %s4663_s27, 3 }
   0x6   : > { %s4765_s15 = scalar_select %p28_p0, %s4659_s26, %s30_s14  }
   0x7   : > { %p39_p3 = por %p38_p2, %p37_p1  ;;  %377 = sbr.rel (%p3701_p4) target bundleno = 21 (0x15), region = 64 }
   0xe   : > { %380 = sbr.rel (!%p39_p3) target bundleno = 21 (0x15), region = 68  ;;  %s382_s16 = sand.u32 (%p39_p3), 1, %s4659_s26  }
   0xf   : > { %s3703_s17 = sshll.u32 (%p39_p3), %s4663_s27, 3  ;;  %s3702_s18 = sshll.u32 (%p39_p3), %s382_s16, 4 }
  0x10   : > { %s386_s21 = scalar_lea.vmem (%p39_p3), %s5189_s0, %s3703_s17  ;;  %s384_s22 = scalar_lea.vmem (%p39_p3), [#allocation2], %s3702_s18 }
  0x11   : > { %v416_v0 = vld [vmem:[%s386_s21] sm:$0xff] (%p39_p3)  ;;  %v418_v1 = vld [vmem:[%s386_s21 + $0x18] sm:$0xff] (%p39_p3) }
  0x12   : > { %417 = vst [vmem:[%s384_s22] sm:$0xff] (%p39_p3), %v416_v0  ;;  %419 = vst [vmem:[%s384_s22 + $0x8] sm:$0xff] (%p39_p3), %v418_v1 }
  0x15 PF: > { %p3704_p5 = scmp.ge.s32.totalorder %s4663_s27, 1  ;;  %p424_p6 = scmp.lt.s32.totalorder %s4663_s27, 4 }
  0x17   : > { %p425_p7 = pnand %p3704_p5, %p424_p6 }
  0x18   : > { %s431_s23 = sand.u32 (!%p425_p7), 1, %s4655_s25   ;;  %vm520_vm0 = vcmask (!%p425_p7), 1042432   ;;  %v479_v2 = vld [vmem:[%s5190_s1] sm:$0xff] (!%p425_p7)  ;;  %vm507_vm1 = vcmask (!%p425_p7), 89088   ;;  %v480_v3 = vld [vmem:[%s5190_s1 + $0x8] sm:$0xff] (!%p425_p7)  ;;  %v481_v4 = vld [vmem:[%s5190_s1 + $0x10] sm:$0xff] (!%p425_p7) }
  0x19   : > { %428 = sbr.rel (%p425_p7) target bundleno = 1389 (0x56d), region = 106  ;;  %s3705_s19 = sshll.u32 (!%p425_p7), %s431_s23, 4  ;;  %v509_v5 = vsel (!%p425_p7), %vm507_vm1, %v479_v2, 0  ;;  %v512_v6 = vsel (!%p425_p7), %vm507_vm1, %v480_v3, 0  ;;  %v515_v7 = vsel (!%p425_p7), %vm507_vm1, %v481_v4, 0  ;;  %v482_v8 = vld [vmem:[%s5190_s1 + $0x18] sm:$0xff] (!%p425_p7) }
  0x1a   : > { %v4788_v9 = vand.u32 (!%p425_p7), 4294901760, %v509_v5  ;;  %v4790_v10 = vand.u32 (!%p425_p7), 4294901760, %v512_v6  ;;  %v4792_v11 = vand.u32 (!%p425_p7), 4294901760, %v515_v7  ;;  %v518_v12 = vsel (!%p425_p7), %vm507_vm1, %v482_v8, 0  ;;  %v483_v14 = vld [vmem:[%s5191_s2] sm:$0xff] (!%p425_p7)  ;;  %s433_s23 = scalar_lea.vmem (!%p425_p7), [#allocation2], %s3705_s19 }
  0x1b   : > { %v4665_v13 = vmov (!%p425_p7), 0   ;;  %v477_v15 = vld [vmem:[%s433_s23] sm:$0xff] (!%p425_p7)  ;;  %v478_v16 = vld [vmem:[%s433_s23 + $0x8] sm:$0x7] (!%p425_p7)  ;;  %v4797_v17 = vand.u32 (!%p425_p7), 4294901760, %v518_v12  ;;  %vm1152_vm2 = vcmask (!%p425_p7), 261120  }
  0x1c   : > { %4635 = vset.pattern.permute.xlu0 (!%p425_p7), %v4665_v13  ;;  %4636 = vset.pattern.permute.xlu1 (!%p425_p7), %v4665_v13  ;;  %v522_v18 = vsel (!%p425_p7), %vm520_vm0, %v478_v16, 0  ;;  %v525_v19 = vand.u32 (!%p425_p7), 4294901760, %v477_v15  ;;  %v592_v20 = vsub.f32 (!%p425_p7), %v509_v5, %v4788_v9  ;;  %v4802_v21 = vsub.f32 (!%p425_p7), %v512_v6, %v4790_v10  ;;  %v484_v22 = vld [vmem:[%s5191_s2 + $0x8] sm:$0xff] (!%p425_p7)  ;;  %v485_v23 = vld [vmem:[%s5191_s2 + $0x10] sm:$0xff] (!%p425_p7)  ;;  %v486_v30 = vld [vmem:[%s5191_s2 + $0x18] sm:$0xff] (!%p425_p7)  ;;  %p473_p8 = scmp.lt.s32.totalorder (!%p425_p7), %s3698_s28, 2 }
  0x1d   : > { %489 = vperm.xlu0 (!%p425_p7), %4635, %v483_v14   ;;  %v528_v24 = vand.u32 (!%p425_p7), 4294901760, %v522_v18  ;;  %v4811_v25 = vsub.f32 (!%p425_p7), %v515_v7, %v4792_v11  ;;  %v4814_v26 = vsub.f32 (!%p425_p7), %v518_v12, %v4797_v17  ;;  %499 = vperm.xlu1 (!%p425_p7), %4636, %v485_v23   ;;  %v1128_v38 = vld [vmem:[%s5193_s4] sm:$0xff] (!%p425_p7)  ;;  %v1129_v48 = vld [vmem:[%s5193_s4 + $0x8] sm:$0xff] (!%p425_p7)  ;;  %v1130_v50 = vld [vmem:[%s5193_s4 + $0x10] sm:$0xff] (!%p425_p7)  ;;  %vm4667_vm15 = vmmov (!%p425_p7), 0  }
  0x1e   : > { %v633_v27 = vsub.f32 (!%p425_p7), %v477_v15, %v525_v19  ;;  %3943 = vmatprep.mubr.f32.mxu0 (!%p425_p7), %v592_v20  ;;  %v593_v28 = vand.u32 (!%p425_p7), 4294901760, %v592_v20  ;;  %v603_v29 = vand.u32 (!%p425_p7), 4294901760, %v4802_v21  ;;  %v1795_v55 = vld [vmem:[%s5195_s6] sm:$0xff] (!%p425_p7)  ;;  %v1131_v56 = vld [vmem:[%s5193_s4 + $0x18] sm:$0xff] (!%p425_p7)  ;;  %v1797_v57 = vld [vmem:[%s5195_s6 + $0x10] sm:$0xff] (!%p425_p7) }
  0x1f   : > { %v4820_v31 = vpack.c.bf16 (!%p425_p7), %v528_v24, %v525_v19  ;;  %v640_v32 = vsub.f32 (!%p425_p7), %v522_v18, %v528_v24  ;;  %v613_v33 = vand.u32 (!%p425_p7), 4294901760, %v4811_v25  ;;  %v623_v34 = vand.u32 (!%p425_p7), 4294901760, %v4814_v26  ;;  %v1796_v58 = vld [vmem:[%s5195_s6 + $0x8] sm:$0xff] (!%p425_p7)  ;;  %v2461_v59 = vld [vmem:[%s5197_s8] sm:$0xff] (!%p425_p7)  ;;  %v1798_v60 = vld [vmem:[%s5195_s6 + $0x18] sm:$0xff] (!%p425_p7) }
  0x20   : > { %v594_v35 = vsub.f32 %v592_v20, %v593_v28  ;;  %v604_v36 = vsub.f32 %v4802_v21, %v603_v29  ;;  %v634_v37 = vand.u32 4294901760, %v633_v27  ;;  %v2463_v61 = vld [vmem:[%s5197_s8 + $0x10] sm:$0xff]  ;;  %v2462_v62 = vld [vmem:[%s5197_s8 + $0x8] sm:$0xff]  ;;  %v3124_v63 = vld [vmem:[%s5199_s10] sm:$0xf]  ;;  %s5207_s28 = smov (!%p473_p8, %s3698_s28), 2 }
  0x21   : > { %494 = vperm.xlu0 %4635, %v484_v22   ;;  %v4305_v39 = vpack.c.bf16 %v640_v32, %v633_v27  ;;  %4298 = vmatprep.subr.bf16.mxu1 %v4820_v31  ;;  %v614_v40 = vsub.f32 %v4811_v25, %v613_v33  ;;  %v641_v41 = vand.u32 4294901760, %v640_v32  ;;  %v624_v42 = vsub.f32 %v4814_v26, %v623_v34  ;;  %v2464_v0 = vld [vmem:[%s5197_s8 + $0x18] sm:$0xff]  ;;  %v3631_v1 = vld [vmem:[%s5201_s12] sm:$0xf]  ;;  %v1125_v15 = vld [vmem:[%s5192_s3 + $0x8] sm:$0xff]  ;;  %s3706_s14 = sshll.u32 %s5207_s28, 2 }
  0x22   : > { %504 = vperm.xlu1 %4636, %v486_v30   ;;  %4300 = vmatpush3.bf16.msra.mxu1 %v4820_v31  ;;  %v595_v43 = vand.u32 4294901760, %v594_v35  ;;  %v605_v44 = vand.u32 4294901760, %v604_v36  ;;  %v635_v45 = vsub.f32 %v633_v27, %v634_v37  ;;  %v3624_v2 = vld [vmem:[%s5200_s11] sm:$0xf]  ;;  %v1126_v16 = vld [vmem:[%s5192_s3 + $0x10] sm:$0xff]  ;;  %v1127_v20 = vld [vmem:[%s5192_s3 + $0x18] sm:$0xff]  ;;  %s476_s18 = scalar_lea.vmem %s5202_s13, %s3706_s14 }
  0x23   : > { %4306 = vmatprep.subr.bf16.mxu0 %v4305_v39  ;;  %v615_v46 = vand.u32 4294901760, %v614_v40  ;;  %v642_v47 = vsub.f32 %v640_v32, %v641_v41  ;;  %v4313_v51 = vpack.c.bf16 %v641_v41, %v634_v37  ;;  %v625_v52 = vand.u32 4294901760, %v624_v42  ;;  %v1124_v3 = vld [vmem:[%s5192_s3] sm:$0xff] }
  0x24   : > { %4308 = vmatpush3.bf16.msra.mxu0 %v4305_v39  ;;  %3923 = vmatprep.mubr.f32.mxu1 %v595_v43  ;;  %v636_v49 = vand.u32 4294901760, %v635_v45  ;;  %v1154_v4 = vsel %vm1152_vm2, %v1124_v3, 0  ;;  %v1160_v19 = vsel %vm1152_vm2, %v1126_v16, 0  ;;  %v1163_v27 = vsel %vm1152_vm2, %v1127_v20, 0 }
  0x25   : > { %1134 = vperm.xlu0 %4635, %v1128_v38   ;;  %4310 = vmatprep.subr.bf16.mxu0 %v4820_v31  ;;  %v643_v53 = vand.u32 4294901760, %v642_v47  ;;  %v4897_v5 = vand.u32 4294901760, %v1154_v4  ;;  %v4925_v35 = vand.u32 4294901760, %v1163_v27 }
  0x26   : > { %3924 = vmatmul.mubr.f32.vlgmr.msra.gmra.mrb[0].mxu1 %v605_v44  ;;  %1139 = vperm.xlu1 %4636, %v1129_v48  }
  0x27   : > { %3926 = vmatprep.mubr.f32.mxu1 %v615_v46  ;;  %3944 = vmatmul.mubr.f32.vlgmr.msra.gmra.mrb[0].mxu0 %v4802_v21  ;;  %v4301_v54 = vpack.c.bf16 %v643_v53, %v636_v49  ;;  %v4900_v6 = vsub.f32 %v1154_v4, %v4897_v5  ;;  %v4932_v49 = vsub.f32 %v1163_v27, %v4925_v35 }
  0x28   : > { %4312 = vmatpush3.bf16.msra.mxu0 %v4820_v31  ;;  %3946 = vmatprep.mubr.f32.mxu0 %v4811_v25 }
  0x29   : > { %1144 = vperm.xlu0 %4635, %v1130_v50   ;;  %4314 = vmatprep.subr.bf16.mxu0 %v4313_v51  ;;  %v1236_v7 = vand.u32 4294901760, %v4900_v6 }
  0x2a   : > { %3927 = vmatmul.mubr.f32.gmra.mrb[2].mxu1 %v625_v52  ;;  %4302 = vmatprep.subr.bf16.mxu1 %v4301_v54 }
  0x2b   : > { %3933 = vmatprep.mubr.f32.mxu1 %v4788_v9  ;;  %3947 = vmatmul.mubr.f32.gmra.mrb[2].mxu0 %v4814_v26  ;;  %v1237_v8 = vsub.f32 %v4900_v6, %v1236_v7  ;;  %v4919_v26 = vand.u32 4294901760, %v1160_v19 }
  0x2c   : > { %4304 = vmatpush3.bf16.msra.mxu1 %v4301_v54  ;;  %3953 = vmatprep.mubr.f32.mxu0 %v593_v28 }
  0x2d   : > { %1801 = vperm.xlu0 %4635, %v1795_v55   ;;  %1149 = vperm.xlu1 %4636, %v1131_v56   ;;  %v4928_v39 = vsub.f32 %v1160_v19, %v4919_v26 }
  0x2f   : > { %3934 = vmatmul.mubr.f32.vlgmr.msra.gmra.mrb[0].mxu1 %v4790_v10  ;;  %3954 = vmatmul.mubr.f32.vlgmr.msra.gmra.mrb[0].mxu0 %v603_v29  ;;  %v1256_v52 = vand.u32 4294901760, %v4928_v39 }
  0x30   : > { %3936 = vmatprep.mubr.f32.mxu1 %v4792_v11  ;;  %4316 = vmatpush3.bf16.msra.mxu0 %v4313_v51 }
  0x31   : > { %3956 = vmatprep.mubr.f32.mxu0 %v613_v33  ;;  %4318 = vmatprep.subr.bf16.mxu0 %v4820_v31 }
  0x32   : > { %1811 = vperm.xlu0 %4635, %v1797_v57   ;;  %1806 = vperm.xlu1 %4636, %v1796_v58  }
  0x33   : > { %3937 = vmatmul.mubr.f32.gmra.mrb[2].mxu1 %v4797_v17  ;;  %3957 = vmatmul.mubr.f32.gmra.mrb[2].mxu0 %v623_v34 }
  0x34   : > { %3963 = vmatprep.mubr.f32.mxu0 %v4788_v9 }
  0x36   : > { %2467 = vperm.xlu0 %4635, %v2461_v59   ;;  %1816 = vperm.xlu1 %4636, %v1798_v60  }
  0x37   : > { %3964 = vmatmul.mubr.f32.vlgmr.msra.gmra.mrb[0].mxu0 %v4790_v10 }
  0x38   : > { %4320 = vmatpush3.bf16.msra.mxu0 %v4820_v31  ;;  %3966 = vmatprep.mubr.f32.mxu0 %v4792_v11 }
  0x3a   : > { %2477 = vperm.xlu0 %4635, %v2463_v61   ;;  %2472 = vperm.xlu1 %4636, %v2462_v62   ;;  %v1266_v62 = vand.u32 4294901760, %v4932_v49 }
  0x3b   : > { %3967 = vmatmul.mubr.f32.gmra.mrb[2].mxu0 %v4797_v17 }
  0x3c   : > { %3973 = vmatprep.mubr.f32.mxu0 %v4788_v9  ;;  %v1238_v9 = vand.u32 4294901760, %v1237_v8 }
  0x3e   : > { %3127 = vperm.xlu0 %4635, %v3124_v63   ;;  %2482 = vperm.xlu1 %4636, %v2464_v0  }
  0x3f   : > { %3974 = vmatmul.mubr.f32.vlgmr.msra.gmra.mrb[0].mxu0 %v4790_v10  ;;  %3987 = vmatprep.mubr.f32.mxu1 %v1238_v9 }
  0x40   : > { %3976 = vmatprep.mubr.f32.mxu0 %v4792_v11 }
  0x42   : > { %3634 = vperm.xlu0 %4635, %v3631_v1   ;;  %3627 = vperm.xlu1 %4636, %v3624_v2   ;;  %v1257_v2 = vsub.f32 %v4928_v39, %v1256_v52 }
  0x43   : > { %3977 = vmatmul.mubr.f32.gmra.mrb[2].mxu0 %v4797_v17  ;;  %v1157_v17 = vsel %vm1152_vm2, %v1125_v15, 0 }
  0x44   : > { %v4917_v22 = vand.u32 4294901760, %v1157_v17 }
  0x46   : > { %v4923_v32 = vsub.f32 %v1157_v17, %v4917_v22  ;;  %v1258_v17 = vand.u32 4294901760, %v1257_v2 }
  0x48   : > { %v1246_v46 = vand.u32 4294901760, %v4923_v32 }
  0x4a   : > { %v1247_v58 = vsub.f32 %v4923_v32, %v1246_v46 }
  0x9c   : > { %v490_v14 = vpop.permute.xlu0 %489  ;;  %v500_v18 = vpop.permute.xlu1 %499 }
  0xa0   : > { %v495_v21 = vpop.permute.xlu0 %494 }
  0xa1   : > { %v505_v30 = vpop.permute.xlu1 %504 }
 0x102   : > { %v3935_v10 = vpop.f32.mrb[0].mxu1 }
 0x103   : > { %v708_v11 = vpop.f32.mrb[1].mxu1  ;;  %v4501_v23 = vadd.f32 %v3935_v10, %v495_v21  ;;  %v1248_v10 = vand.u32 4294901760, %v1247_v58 }
 0x104   : > { %v4503_v24 = vadd.f32 %v708_v11, %v490_v14  ;;  %v1267_v14 = vsub.f32 %v4932_v49, %v1266_v62 }
 0x106   : > { %v3938_v12 = vpop.f32.mrb[2].mxu1 }
 0x107   : > { %v720_v13 = vpop.f32.mrb[3].mxu1  ;;  %v4505_v33 = vadd.f32 %v3938_v12, %v505_v30 }
 0x108   : > { %v4507_v36 = vadd.f32 %v720_v13, %v500_v18 }
 0x112   : > { %v3975_v25 = vpop.f32.mrb[0].mxu0 }
 0x113   : > { %v4502_v28 = vadd.f32 %v4501_v23, %v3975_v25  ;;  %v1090_v29 = vpop.f32.mrb[1].mxu0 }
 0x114   : > { %v4504_v31 = vadd.f32 %v4503_v24, %v1090_v29  ;;  %v1268_v24 = vand.u32 4294901760, %v1267_v14 }
 0x115   : > { %vm1113_vm3 = vcmp.gt.f32.partialorder %v4502_v28, 0.0  ;;  %v1117_v34 = vmul.f32 0.1, %v4502_v28 }
 0x116   : > { %vm1112_vm4 = vcmp.gt.f32.partialorder %v4504_v31, 0.0  ;;  %v1116_v37 = vmul.f32 0.1, %v4504_v31  ;;  %v3978_v38 = vpop.f32.mrb[2].mxu0 }
 0x117   : > { %v1121_v40 = vsel %vm1113_vm3, %v4502_v28, %v1117_v34  ;;  %v4506_v41 = vadd.f32 %v4505_v33, %v3978_v38  ;;  %v1102_v42 = vpop.f32.mrb[3].mxu0  ;;  %v1794_v34 = vld [vmem:[%s5194_s5 + $0x18] sm:$0xff] }
 0x118   : > { %v1169_v43 = vand.u32 4294901760, %v1121_v40  ;;  %v1120_v44 = vsel %vm1112_vm4, %v4504_v31, %v1116_v37  ;;  %v4508_v45 = vadd.f32 %v4507_v36, %v1102_v42  ;;  %v1793_v31 = vld [vmem:[%s5194_s5 + $0x10] sm:$0xff]  ;;  %v1135_v37 = vpop.permute.xlu0 %1134 }
 0x119   : > { %v1166_v47 = vand.u32 4294901760, %v1120_v44  ;;  %vm1115_vm5 = vcmp.gt.f32.partialorder %v4506_v41, 0.0  ;;  %v1119_v48 = vmul.f32 0.1, %v4506_v41  ;;  %v1826_v33 = vsel %vm1152_vm2, %v1793_v31, 0 }
 0x11a   : > { %v1283_v50 = vsub.f32 %v1121_v40, %v1169_v43  ;;  %vm1114_vm6 = vcmp.gt.f32.partialorder %v4508_v45, 0.0  ;;  %v1118_v51 = vmul.f32 0.1, %v4508_v45  ;;  %v1829_v40 = vsel %vm1152_vm2, %v1794_v34, 0 }
 0x11b   : > { %v4935_v53 = vpack.c.bf16 %v1169_v43, %v1166_v47  ;;  %v1276_v54 = vsub.f32 %v1120_v44, %v1166_v47  ;;  %v1123_v55 = vsel %vm1115_vm5, %v4506_v41, %v1119_v48 }
 0x11c   : > { %v1175_v56 = vand.u32 4294901760, %v1123_v55  ;;  %v1122_v57 = vsel %vm1114_vm6, %v4508_v45, %v1118_v51  ;;  %v1284_v59 = vand.u32 4294901760, %v1283_v50  ;;  %v1145_v51 = vpop.permute.xlu0 %1144 }
 0x11d   : > { %v1172_v60 = vand.u32 4294901760, %v1122_v57  ;;  %4322 = vmatprep.subr.bf16.mxu1 %v4935_v53  ;;  %v1277_v61 = vand.u32 4294901760, %v1276_v54  ;;  %v4337_v63 = vpack.c.bf16 %v1283_v50, %v1276_v54 }
 0x11e   : > { %v1297_v0 = vsub.f32 %v1123_v55, %v1175_v56  ;;  %4324 = vmatpush3.bf16.msra.mxu1 %v4935_v53  ;;  %v1285_v1 = vsub.f32 %v1283_v50, %v1284_v59 }
 0x11f   : > { %v4325_v3 = vpack.c.bf16 %v1175_v56, %v1172_v60  ;;  %v1290_v4 = vsub.f32 %v1122_v57, %v1172_v60  ;;  %v1278_v8 = vsub.f32 %v1276_v54, %v1277_v61  ;;  %v4353_v9 = vpack.c.bf16 %v1284_v59, %v1277_v61 }
 0x120   : > { %v1286_v11 = vand.u32 4294901760, %v1285_v1  ;;  %v1298_v12 = vand.u32 4294901760, %v1297_v0 }
 0x121   : > { %4326 = vmatprep.subr.bf16.mxu1 %v4325_v3  ;;  %v1279_v13 = vand.u32 4294901760, %v1278_v8  ;;  %v1291_v15 = vand.u32 4294901760, %v1290_v4  ;;  %v4341_v16 = vpack.c.bf16 %v1297_v0, %v1290_v4 }
 0x122   : > { %4328 = vmatpush3.bf16.msra.mxu1 %v4325_v3  ;;  %v1299_v18 = vsub.f32 %v1297_v0, %v1298_v12 }
 0x123   : > { %v4329_v19 = vpack.c.bf16 %v1286_v11, %v1279_v13  ;;  %v1292_v20 = vsub.f32 %v1290_v4, %v1291_v15  ;;  %v4357_v21 = vpack.c.bf16 %v1298_v12, %v1291_v15 }
 0x124   : > { %v1300_v23 = vand.u32 4294901760, %v1299_v18 }
 0x125   : > { %3988 = vmatmul.mubr.f32.vlgmr.msra.gmra.mrb[4].mxu1 %v1248_v10  ;;  %4330 = vmatprep.subr.bf16.mxu1 %v4329_v19  ;;  %v1293_v25 = vand.u32 4294901760, %v1292_v20 }
 0x126   : > { %4332 = vmatpush3.bf16.msra.mxu1 %v4329_v19  ;;  %3990 = vmatprep.mubr.f32.mxu1 %v1258_v17 }
 0x127   : > { %v4333_v27 = vpack.c.bf16 %v1300_v23, %v1293_v25 }
 0x129   : > { %3991 = vmatmul.mubr.f32.gmra.mrb[6].mxu1 %v1268_v24  ;;  %4334 = vmatprep.subr.bf16.mxu1 %v4333_v27 }
 0x12a   : > { %4336 = vmatpush3.bf16.msra.mxu1 %v4333_v27  ;;  %4001 = vmatprep.mubr.f32.mxu1 %v4897_v5 }
 0x12b   : > { %4338 = vmatprep.subr.bf16.mxu1 %v4337_v63 }
 0x12d   : > { %4002 = vmatmul.mubr.f32.vlgmr.msra.gmra.mrb[4].mxu1 %v4917_v22 }
 0x12e   : > { %4340 = vmatpush3.bf16.msra.mxu1 %v4337_v63  ;;  %4004 = vmatprep.mubr.f32.mxu1 %v4919_v26 }
 0x12f   : > { %4342 = vmatprep.subr.bf16.mxu1 %v4341_v16 }
 0x131   : > { %4005 = vmatmul.mubr.f32.gmra.mrb[6].mxu1 %v4925_v35 }
 0x132   : > { %4344 = vmatpush3.bf16.msra.mxu1 %v4341_v16  ;;  %4015 = vmatprep.mubr.f32.mxu1 %v4900_v6  ;;  %v1791_v6 = vld [vmem:[%s5194_s5] sm:$0xff] }
 0x133   : > { %4346 = vmatprep.subr.bf16.mxu1 %v4935_v53 }
 0x135   : > { %4016 = vmatmul.mubr.f32.vlgmr.msra.gmra.mrb[4].mxu1 %v4923_v32 }
 0x136   : > { %4348 = vmatpush3.bf16.msra.mxu1 %v4935_v53  ;;  %4018 = vmatprep.mubr.f32.mxu1 %v4928_v39  ;;  %v4999_v39 = vand.u32 4294901760, %v1826_v33 }
 0x137   : > { %4350 = vmatprep.subr.bf16.mxu1 %v4325_v3 }
 0x138   : > { %v5008_v50 = vsub.f32 %v1826_v33, %v4999_v39 }
 0x139   : > { %4019 = vmatmul.mubr.f32.gmra.mrb[6].mxu1 %v4932_v49 }
 0x13a   : > { %4352 = vmatpush3.bf16.msra.mxu1 %v4325_v3  ;;  %4029 = vmatprep.mubr.f32.mxu1 %v1236_v7  ;;  %v1820_v7 = vsel %vm1152_vm2, %v1791_v6, 0  ;;  %v1922_v0 = vand.u32 4294901760, %v5008_v50 }
 0x13b   : > { %4354 = vmatprep.subr.bf16.mxu1 %v4353_v9  ;;  %v4977_v28 = vand.u32 4294901760, %v1820_v7 }
 0x13c   : > { %v1923_v17 = vsub.f32 %v5008_v50, %v1922_v0 }
 0x13d   : > { %4030 = vmatmul.mubr.f32.vlgmr.msra.gmra.mrb[4].mxu1 %v1246_v46  ;;  %v4980_v29 = vsub.f32 %v1820_v7, %v4977_v28  ;;  %v5005_v46 = vand.u32 4294901760, %v1829_v40 }
 0x13e   : > { %4356 = vmatpush3.bf16.msra.mxu1 %v4353_v9  ;;  %4032 = vmatprep.mubr.f32.mxu1 %v1256_v52 }
 0x13f   : > { %4358 = vmatprep.subr.bf16.mxu1 %v4357_v21  ;;  %v1902_v30 = vand.u32 4294901760, %v4980_v29  ;;  %v5012_v61 = vsub.f32 %v1829_v40, %v5005_v46 }
 0x141   : > { %4033 = vmatmul.mubr.f32.gmra.mrb[6].mxu1 %v1266_v62  ;;  %v1932_v13 = vand.u32 4294901760, %v5012_v61 }
 0x142   : > { %4360 = vmatpush3.bf16.msra.mxu1 %v4357_v21  ;;  %4043 = vmatprep.mubr.f32.mxu1 %v4897_v5 }
 0x143   : > { %4362 = vmatprep.subr.bf16.mxu1 %v4935_v53  ;;  %v1933_v6 = vsub.f32 %v5012_v61, %v1932_v13 }
 0x145   : > { %4044 = vmatmul.mubr.f32.vlgmr.msra.gmra.mrb[4].mxu1 %v4917_v22 }
 0x146   : > { %4364 = vmatpush3.bf16.msra.mxu1 %v4935_v53  ;;  %4046 = vmatprep.mubr.f32.mxu1 %v4919_v26 }
 0x147   : > { %4366 = vmatprep.subr.bf16.mxu1 %v4325_v3 }
 0x149   : > { %4047 = vmatmul.mubr.f32.gmra.mrb[6].mxu1 %v4925_v35 }
 0x14a   : > { %4368 = vmatpush3.bf16.msra.mxu1 %v4325_v3  ;;  %4057 = vmatprep.mubr.f32.mxu1 %v4897_v5  ;;  %v1903_v5 = vsub.f32 %v4980_v29, %v1902_v30 }
 0x14d   : > { %4058 = vmatmul.mubr.f32.vlgmr.msra.gmra.mrb[4].mxu1 %v4917_v22  ;;  %v1904_v22 = vand.u32 4294901760, %v1903_v5 }
 0x14e   : > { %4060 = vmatprep.mubr.f32.mxu1 %v4919_v26  ;;  %v1792_v26 = vld [vmem:[%s5194_s5 + $0x8] sm:$0xff] }
 0x14f   : > { %4071 = vmatprep.mubr.f32.mxu0 %v1904_v22  ;;  %v1823_v32 = vsel %vm1152_vm2, %v1792_v26, 0  ;;  %v1924_v22 = vand.u32 4294901760, %v1923_v17 }
 0x150   : > { %v4997_v36 = vand.u32 4294901760, %v1823_v32 }
 0x151   : > { %4061 = vmatmul.mubr.f32.gmra.mrb[6].mxu1 %v4925_v35  ;;  %v1140_v35 = vpop.permute.xlu1 %1139 }
 0x152   : > { %v5003_v44 = vsub.f32 %v1823_v32, %v4997_v36 }
 0x154   : > { %v1912_v58 = vand.u32 4294901760, %v5003_v44 }
 0x155   : > { %v1150_v47 = vpop.permute.xlu1 %1149 }
 0x156   : > { %v1913_v9 = vsub.f32 %v5003_v44, %v1912_v58 }
 0x158   : > { %v1914_v23 = vand.u32 4294901760, %v1913_v9 }
 0x220   : > { %v4059_v38 = vpop.f32.mrb[4].mxu1 }
 0x221   : > { %v4509_v41 = vadd.f32 %v4059_v38, %v1140_v35  ;;  %v1757_v42 = vpop.f32.mrb[5].mxu1  ;;  %v1934_v35 = vand.u32 4294901760, %v1933_v6 }
 0x222   : > { %v4510_v43 = vadd.f32 %v1757_v42, %v1135_v37 }
 0x223   : > { %vm1780_vm7 = vcmp.gt.f32.partialorder %v4509_v41, 0.0  ;;  %v1784_v45 = vmul.f32 0.1, %v4509_v41 }
 0x224   : > { %vm1779_vm8 = vcmp.gt.f32.partialorder %v4510_v43, 0.0  ;;  %v1783_v48 = vmul.f32 0.1, %v4510_v43  ;;  %v4062_v49 = vpop.f32.mrb[6].mxu1 }
 0x225   : > { %v1788_v52 = vsel %vm1780_vm7, %v4509_v41, %v1784_v45  ;;  %v4511_v53 = vadd.f32 %v4062_v49, %v1150_v47  ;;  %v1769_v54 = vpop.f32.mrb[7].mxu1  ;;  %v1807_v47 = vpop.permute.xlu1 %1806 }
 0x226   : > { %v1835_v55 = vand.u32 4294901760, %v1788_v52  ;;  %v1787_v56 = vsel %vm1779_vm8, %v4510_v43, %v1783_v48  ;;  %v4512_v57 = vadd.f32 %v1769_v54, %v1145_v51  ;;  %v2459_v43 = vld [vmem:[%s5196_s7 + $0x10] sm:$0xff]  ;;  %v1802_v49 = vpop.permute.xlu0 %1801 }
 0x227   : > { %v1832_v59 = vand.u32 4294901760, %v1787_v56  ;;  %vm1782_vm9 = vcmp.gt.f32.partialorder %v4511_v53, 0.0  ;;  %v1786_v60 = vmul.f32 0.1, %v4511_v53  ;;  %v2492_v45 = vsel %vm1152_vm2, %v2459_v43, 0 }
 0x228   : > { %v1949_v62 = vsub.f32 %v1788_v52, %v1835_v55  ;;  %vm1781_vm10 = vcmp.gt.f32.partialorder %v4512_v57, 0.0  ;;  %v1785_v63 = vmul.f32 0.1, %v4512_v57  ;;  %v5079_v51 = vand.u32 4294901760, %v2492_v45 }
 0x229   : > { %v5015_v1 = vpack.c.bf16 %v1835_v55, %v1832_v59  ;;  %v1942_v2 = vsub.f32 %v1787_v56, %v1832_v59  ;;  %v1790_v3 = vsel %vm1782_vm9, %v4511_v53, %v1786_v60  ;;  %v1817_v59 = vpop.permute.xlu1 %1816 }
 0x22a   : > { %v1841_v4 = vand.u32 4294901760, %v1790_v3  ;;  %v1789_v8 = vsel %vm1781_vm10, %v4512_v57, %v1785_v63  ;;  %v1950_v10 = vand.u32 4294901760, %v1949_v62  ;;  %v1812_v63 = vpop.permute.xlu0 %1811 }
 0x22b   : > { %v1838_v11 = vand.u32 4294901760, %v1789_v8  ;;  %4370 = vmatprep.subr.bf16.mxu0 %v5015_v1  ;;  %v1943_v12 = vand.u32 4294901760, %v1942_v2  ;;  %v4385_v14 = vpack.c.bf16 %v1949_v62, %v1942_v2 }
 0x22c   : > { %v1963_v15 = vsub.f32 %v1790_v3, %v1841_v4  ;;  %4372 = vmatpush3.bf16.msra.mxu0 %v5015_v1  ;;  %v1951_v16 = vsub.f32 %v1949_v62, %v1950_v10  ;;  %v5088_v62 = vsub.f32 %v2492_v45, %v5079_v51 }
 0x22d   : > { %v4373_v18 = vpack.c.bf16 %v1841_v4, %v1838_v11  ;;  %v1956_v19 = vsub.f32 %v1789_v8, %v1838_v11  ;;  %v1944_v20 = vsub.f32 %v1942_v2, %v1943_v12  ;;  %v4401_v21 = vpack.c.bf16 %v1950_v10, %v1943_v12 }
 0x22e   : > { %v1952_v24 = vand.u32 4294901760, %v1951_v16  ;;  %v1964_v25 = vand.u32 4294901760, %v1963_v15 }
 0x22f   : > { %4374 = vmatprep.subr.bf16.mxu0 %v4373_v18  ;;  %v1945_v27 = vand.u32 4294901760, %v1944_v20  ;;  %v1957_v7 = vand.u32 4294901760, %v1956_v19  ;;  %v4389_v5 = vpack.c.bf16 %v1963_v15, %v1956_v19 }
 0x230   : > { %4376 = vmatpush3.bf16.msra.mxu0 %v4373_v18  ;;  %v1965_v26 = vsub.f32 %v1963_v15, %v1964_v25  ;;  %v2588_v15 = vand.u32 4294901760, %v5088_v62 }
 0x231   : > { %v4377_v31 = vpack.c.bf16 %v1952_v24, %v1945_v27  ;;  %v1958_v32 = vsub.f32 %v1956_v19, %v1957_v7  ;;  %v4405_v33 = vpack.c.bf16 %v1964_v25, %v1957_v7 }
 0x232   : > { %v1966_v34 = vand.u32 4294901760, %v1965_v26 }
 0x233   : > { %4072 = vmatmul.mubr.f32.vlgmr.msra.gmra.mrb[4].mxu0 %v1914_v23  ;;  %4378 = vmatprep.subr.bf16.mxu0 %v4377_v31  ;;  %v1959_v37 = vand.u32 4294901760, %v1958_v32 }
 0x234   : > { %4380 = vmatpush3.bf16.msra.mxu0 %v4377_v31  ;;  %4074 = vmatprep.mubr.f32.mxu0 %v1924_v22  ;;  %v2589_v22 = vsub.f32 %v5088_v62, %v2588_v15 }
 0x235   : > { %v4381_v38 = vpack.c.bf16 %v1966_v34, %v1959_v37 }
 0x237   : > { %4075 = vmatmul.mubr.f32.gmra.mrb[6].mxu0 %v1934_v35  ;;  %4382 = vmatprep.subr.bf16.mxu0 %v4381_v38 }
 0x238   : > { %4384 = vmatpush3.bf16.msra.mxu0 %v4381_v38  ;;  %4085 = vmatprep.mubr.f32.mxu0 %v4977_v28 }
 0x239   : > { %4386 = vmatprep.subr.bf16.mxu0 %v4385_v14 }
 0x23b   : > { %4086 = vmatmul.mubr.f32.vlgmr.msra.gmra.mrb[4].mxu0 %v4997_v36 }
 0x23c   : > { %4388 = vmatpush3.bf16.msra.mxu0 %v4385_v14  ;;  %4088 = vmatprep.mubr.f32.mxu0 %v4999_v39 }
 0x23d   : > { %4390 = vmatprep.subr.bf16.mxu0 %v4389_v5 }
 0x23f   : > { %4089 = vmatmul.mubr.f32.gmra.mrb[6].mxu0 %v5005_v46 }
 0x240   : > { %4392 = vmatpush3.bf16.msra.mxu0 %v4389_v5  ;;  %4099 = vmatprep.mubr.f32.mxu0 %v4980_v29  ;;  %v2457_v29 = vld [vmem:[%s5196_s7] sm:$0xff] }
 0x241   : > { %4394 = vmatprep.subr.bf16.mxu0 %v5015_v1 }
 0x243   : > { %4100 = vmatmul.mubr.f32.vlgmr.msra.gmra.mrb[4].mxu0 %v5003_v44 }
 0x244   : > { %4396 = vmatpush3.bf16.msra.mxu0 %v5015_v1  ;;  %4102 = vmatprep.mubr.f32.mxu0 %v5008_v50 }
 0x245   : > { %4398 = vmatprep.subr.bf16.mxu0 %v4373_v18 }
 0x247   : > { %4103 = vmatmul.mubr.f32.gmra.mrb[6].mxu0 %v5012_v61 }
 0x248   : > { %4400 = vmatpush3.bf16.msra.mxu0 %v4373_v18  ;;  %4113 = vmatprep.mubr.f32.mxu0 %v1902_v30  ;;  %v2486_v30 = vsel %vm1152_vm2, %v2457_v29, 0 }
 0x249   : > { %4402 = vmatprep.subr.bf16.mxu0 %v4401_v21  ;;  %v5057_v40 = vand.u32 4294901760, %v2486_v30 }
 0x24b   : > { %4114 = vmatmul.mubr.f32.vlgmr.msra.gmra.mrb[4].mxu0 %v1912_v58  ;;  %v5060_v41 = vsub.f32 %v2486_v30, %v5057_v40 }
 0x24c   : > { %4404 = vmatpush3.bf16.msra.mxu0 %v4401_v21  ;;  %4116 = vmatprep.mubr.f32.mxu0 %v1922_v0 }
 0x24d   : > { %4406 = vmatprep.subr.bf16.mxu0 %v4405_v33  ;;  %v2568_v42 = vand.u32 4294901760, %v5060_v41 }
 0x24f   : > { %4117 = vmatmul.mubr.f32.gmra.mrb[6].mxu0 %v1932_v13 }
 0x250   : > { %4408 = vmatpush3.bf16.msra.mxu0 %v4405_v33  ;;  %4127 = vmatprep.mubr.f32.mxu0 %v4977_v28 }
 0x251   : > { %4410 = vmatprep.subr.bf16.mxu0 %v5015_v1 }
 0x253   : > { %4128 = vmatmul.mubr.f32.vlgmr.msra.gmra.mrb[4].mxu0 %v4997_v36 }
 0x254   : > { %4412 = vmatpush3.bf16.msra.mxu0 %v5015_v1  ;;  %4130 = vmatprep.mubr.f32.mxu0 %v4999_v39 }
 0x255   : > { %4414 = vmatprep.subr.bf16.mxu0 %v4373_v18 }
 0x257   : > { %4131 = vmatmul.mubr.f32.gmra.mrb[6].mxu0 %v5005_v46 }
 0x258   : > { %4416 = vmatpush3.bf16.msra.mxu0 %v4373_v18  ;;  %4141 = vmatprep.mubr.f32.mxu0 %v4977_v28  ;;  %v2569_v28 = vsub.f32 %v5060_v41, %v2568_v42 }
 0x25b   : > { %4142 = vmatmul.mubr.f32.vlgmr.msra.gmra.mrb[4].mxu0 %v4997_v36  ;;  %v2570_v36 = vand.u32 4294901760, %v2569_v28 }
 0x25c   : > { %4144 = vmatprep.mubr.f32.mxu0 %v4999_v39  ;;  %v2458_v39 = vld [vmem:[%s5196_s7 + $0x8] sm:$0xff] }
 0x25d   : > { %4155 = vmatprep.mubr.f32.mxu1 %v2570_v36  ;;  %v2489_v44 = vsel %vm1152_vm2, %v2458_v39, 0  ;;  %v2590_v36 = vand.u32 4294901760, %v2589_v22 }
 0x25e   : > { %v5077_v48 = vand.u32 4294901760, %v2489_v44 }
 0x25f   : > { %4145 = vmatmul.mubr.f32.gmra.mrb[6].mxu0 %v5005_v46  ;;  %v2460_v46 = vld [vmem:[%s5196_s7 + $0x18] sm:$0xff] }
 0x260   : > { %v2495_v52 = vsel %vm1152_vm2, %v2460_v46, 0  ;;  %v5083_v56 = vsub.f32 %v2489_v44, %v5077_v48 }
 0x261   : > { %v5085_v58 = vand.u32 4294901760, %v2495_v52 }
 0x262   : > { %v2578_v9 = vand.u32 4294901760, %v5083_v56 }
 0x263   : > { %v5092_v12 = vsub.f32 %v2495_v52, %v5085_v58 }
 0x264   : > { %v2579_v21 = vsub.f32 %v5083_v56, %v2578_v9 }
 0x265   : > { %v2598_v27 = vand.u32 4294901760, %v5092_v12 }
 0x266   : > { %v2580_v34 = vand.u32 4294901760, %v2579_v21 }
 0x267   : > { %v2599_v29 = vsub.f32 %v5092_v12, %v2598_v27 }
 0x32e   : > { %v4143_v50 = vpop.f32.mrb[4].mxu0 }
 0x32f   : > { %v4513_v53 = vadd.f32 %v4143_v50, %v1807_v47  ;;  %v2423_v54 = vpop.f32.mrb[5].mxu0  ;;  %v2600_v47 = vand.u32 4294901760, %v2599_v29 }
 0x330   : > { %v4514_v55 = vadd.f32 %v2423_v54, %v1802_v49 }
 0x331   : > { %vm2446_vm11 = vcmp.gt.f32.partialorder %v4513_v53, 0.0  ;;  %v2450_v57 = vmul.f32 0.1, %v4513_v53 }
 0x332   : > { %vm2445_vm12 = vcmp.gt.f32.partialorder %v4514_v55, 0.0  ;;  %v2449_v60 = vmul.f32 0.1, %v4514_v55  ;;  %v4146_v61 = vpop.f32.mrb[6].mxu0 }
 0x333   : > { %v2454_v0 = vsel %vm2446_vm11, %v4513_v53, %v2450_v57  ;;  %v4515_v1 = vadd.f32 %v4146_v61, %v1817_v59  ;;  %v2435_v2 = vpop.f32.mrb[7].mxu0  ;;  %v2468_v53 = vpop.permute.xlu0 %2467 }
 0x334   : > { %v2501_v3 = vand.u32 4294901760, %v2454_v0  ;;  %v2453_v4 = vsel %vm2445_vm12, %v4514_v55, %v2449_v60  ;;  %v4516_v8 = vadd.f32 %v2435_v2, %v1812_v63 }
 0x335   : > { %v2498_v10 = vand.u32 4294901760, %v2453_v4  ;;  %vm2448_vm13 = vcmp.gt.f32.partialorder %v4515_v1, 0.0  ;;  %v2452_v11 = vmul.f32 0.1, %v4515_v1 }
 0x336   : > { %v2615_v13 = vsub.f32 %v2454_v0, %v2501_v3  ;;  %vm2447_vm14 = vcmp.gt.f32.partialorder %v4516_v8, 0.0  ;;  %v2451_v14 = vmul.f32 0.1, %v4516_v8 }
 0x337   : > { %v5095_v16 = vpack.c.bf16 %v2501_v3, %v2498_v10  ;;  %v2608_v17 = vsub.f32 %v2453_v4, %v2498_v10  ;;  %v2456_v18 = vsel %vm2448_vm13, %v4515_v1, %v2452_v11  ;;  %v2478_v63 = vpop.permute.xlu0 %2477 }
 0x338   : > { %v2507_v19 = vand.u32 4294901760, %v2456_v18  ;;  %v2455_v20 = vsel %vm2447_vm14, %v4516_v8, %v2451_v14  ;;  %v2616_v23 = vand.u32 4294901760, %v2615_v13 }
 0x339   : > { %v2504_v24 = vand.u32 4294901760, %v2455_v20  ;;  %4418 = vmatprep.subr.bf16.mxu1 %v5095_v16  ;;  %v2609_v25 = vand.u32 4294901760, %v2608_v17  ;;  %v4433_v6 = vpack.c.bf16 %v2615_v13, %v2608_v17 }
 0x33a   : > { %v2629_v7 = vsub.f32 %v2456_v18, %v2507_v19  ;;  %4420 = vmatpush3.bf16.msra.mxu1 %v5095_v16  ;;  %v2617_v5 = vsub.f32 %v2615_v13, %v2616_v23 }
 0x33b   : > { %v4421_v26 = vpack.c.bf16 %v2507_v19, %v2504_v24  ;;  %v2622_v31 = vsub.f32 %v2455_v20, %v2504_v24  ;;  %v2610_v32 = vsub.f32 %v2608_v17, %v2609_v25  ;;  %v4449_v33 = vpack.c.bf16 %v2616_v23, %v2609_v25 }
 0x33c   : > { %v2618_v35 = vand.u32 4294901760, %v2617_v5  ;;  %v2630_v37 = vand.u32 4294901760, %v2629_v7 }
 0x33d   : > { %4422 = vmatprep.subr.bf16.mxu1 %v4421_v26  ;;  %v2611_v38 = vand.u32 4294901760, %v2610_v32  ;;  %v2623_v30 = vand.u32 4294901760, %v2622_v31  ;;  %v4437_v28 = vpack.c.bf16 %v2629_v7, %v2622_v31 }
 0x33e   : > { %4424 = vmatpush3.bf16.msra.mxu1 %v4421_v26  ;;  %v2631_v39 = vsub.f32 %v2629_v7, %v2630_v37 }
 0x33f   : > { %v4425_v43 = vpack.c.bf16 %v2618_v35, %v2611_v38  ;;  %v2624_v44 = vsub.f32 %v2622_v31, %v2623_v30  ;;  %v4453_v45 = vpack.c.bf16 %v2630_v37, %v2623_v30 }
 0x340   : > { %v2632_v46 = vand.u32 4294901760, %v2631_v39 }
 0x341   : > { %4156 = vmatmul.mubr.f32.vlgmr.msra.gmra.mrb[8].mxu1 %v2580_v34  ;;  %4426 = vmatprep.subr.bf16.mxu1 %v4425_v43  ;;  %v2625_v49 = vand.u32 4294901760, %v2624_v44 }
 0x342   : > { %4428 = vmatpush3.bf16.msra.mxu1 %v4425_v43  ;;  %4158 = vmatprep.mubr.f32.mxu1 %v2590_v36 }
 0x343   : > { %v4429_v50 = vpack.c.bf16 %v2632_v46, %v2625_v49 }
 0x345   : > { %4159 = vmatmul.mubr.f32.gmra.mrb[10].mxu1 %v2600_v47  ;;  %4430 = vmatprep.subr.bf16.mxu1 %v4429_v50 }
 0x346   : > { %4432 = vmatpush3.bf16.msra.mxu1 %v4429_v50  ;;  %4169 = vmatprep.mubr.f32.mxu1 %v5057_v40 }
 0x347   : > { %4434 = vmatprep.subr.bf16.mxu1 %v4433_v6 }
 0x349   : > { %4170 = vmatmul.mubr.f32.vlgmr.msra.gmra.mrb[8].mxu1 %v5077_v48 }
 0x34a   : > { %4436 = vmatpush3.bf16.msra.mxu1 %v4433_v6  ;;  %4172 = vmatprep.mubr.f32.mxu1 %v5079_v51 }
 0x34b   : > { %4438 = vmatprep.subr.bf16.mxu1 %v4437_v28 }
 0x34d   : > { %4173 = vmatmul.mubr.f32.gmra.mrb[10].mxu1 %v5085_v58 }
 0x34e   : > { %4440 = vmatpush3.bf16.msra.mxu1 %v4437_v28  ;;  %4183 = vmatprep.mubr.f32.mxu1 %v5060_v41  ;;  %v4666_v41 = vmov 0.0|0.0  }
 0x34f   : > { %4442 = vmatprep.subr.bf16.mxu1 %v5095_v16  ;;  %4471 = vmatprep.subr.bf16.mxu0 %v4666_v41 }
 0x351   : > { %4184 = vmatmul.mubr.f32.vlgmr.msra.gmra.mrb[8].mxu1 %v5083_v56 }
 0x352   : > { %4444 = vmatpush3.bf16.msra.mxu1 %v5095_v16  ;;  %4186 = vmatprep.mubr.f32.mxu1 %v5088_v62 }
 0x353   : > { %4446 = vmatprep.subr.bf16.mxu1 %v4421_v26 }
 0x355   : > { %4187 = vmatmul.mubr.f32.gmra.mrb[10].mxu1 %v5092_v12 }
 0x356   : > { %4448 = vmatpush3.bf16.msra.mxu1 %v4421_v26  ;;  %4197 = vmatprep.mubr.f32.mxu1 %v2568_v42  ;;  %v4668_v42 = vmov 0.0  }
 0x357   : > { %4450 = vmatprep.subr.bf16.mxu1 %v4449_v33  ;;  %4250 = vmatprep.mubr.msk.f32.mxu0 %vm4667_vm15, %v4668_v42 }
 0x359   : > { %4198 = vmatmul.mubr.f32.vlgmr.msra.gmra.mrb[8].mxu1 %v2578_v9 }
 0x35a   : > { %4452 = vmatpush3.bf16.msra.mxu1 %v4449_v33  ;;  %4200 = vmatprep.mubr.f32.mxu1 %v2588_v15 }
 0x35b   : > { %4454 = vmatprep.subr.bf16.mxu1 %v4453_v45 }
 0x35d   : > { %4201 = vmatmul.mubr.f32.gmra.mrb[10].mxu1 %v2598_v27 }
 0x35e   : > { %4456 = vmatpush3.bf16.msra.mxu1 %v4453_v45  ;;  %4211 = vmatprep.mubr.f32.mxu1 %v5057_v40  ;;  %v3128_v45 = vpop.permute.xlu0 %3127 }
 0x35f   : > { %4458 = vmatprep.subr.bf16.mxu1 %v5095_v16 }
 0x361   : > { %4212 = vmatmul.mubr.f32.vlgmr.msra.gmra.mrb[8].mxu1 %v5077_v48 }
 0x362   : > { %4460 = vmatpush3.bf16.msra.mxu1 %v5095_v16  ;;  %4214 = vmatprep.mubr.f32.mxu1 %v5079_v51 }
 0x363   : > { %4462 = vmatprep.subr.bf16.mxu1 %v4421_v26 }
 0x365   : > { %4215 = vmatmul.mubr.f32.gmra.mrb[10].mxu1 %v5085_v58 }
 0x366   : > { %4464 = vmatpush3.bf16.msra.mxu1 %v4421_v26  ;;  %4225 = vmatprep.mubr.f32.mxu1 %v5057_v40  ;;  %v3123_v40 = vld [vmem:[%s5198_s9] sm:$0xf] }
 0x367   : > { %4465 = vmatprep.subr.bf16.mxu1 %v4666_v41 }
 0x369   : > { %4226 = vmatmul.mubr.f32.vlgmr.msra.gmra.mrb[8].mxu1 %v5077_v48  ;;  %v3131_v48 = vsel %vm1152_vm2, %v3123_v40, 0 }
 0x36a   : > { %4228 = vmatprep.mubr.f32.mxu1 %v5079_v51  ;;  %v2473_v51 = vpop.permute.xlu1 %2472  ;;  %v5143_v52 = vand.u32 4294901760, %v3131_v48 }
 0x36d   : > { %4229 = vmatmul.mubr.f32.gmra.mrb[10].mxu1 %v5085_v58  ;;  %v5146_v58 = vsub.f32 %v3131_v48, %v5143_v52 }
 0x36e   : > { %4239 = vmatprep.mubr.msk.f32.mxu1 %vm4667_vm15, %v4668_v42  ;;  %v2483_v60 = vpop.permute.xlu1 %2482 }
 0x36f   : > { %v3204_v9 = vand.u32 4294901760, %v5146_v58 }
 0x371   : > { %v3205_v20 = vsub.f32 %v5146_v58, %v3204_v9 }
 0x373   : > { %v3206_v31 = vand.u32 4294901760, %v3205_v20 }
 0x43c   : > { %v4227_v54 = vpop.f32.mrb[8].mxu1 }
 0x43d   : > { %v4517_v55 = vadd.f32 %v4227_v54, %v2473_v51  ;;  %v3089_v56 = vpop.f32.mrb[9].mxu1  ;;  %v3635_v54 = vpop.permute.xlu0 %3634 }
 0x43e   : > { %v4518_v57 = vadd.f32 %v3089_v56, %v2468_v53 }
 0x43f   : > { %vm3112_vm0 = vcmp.gt.f32.partialorder %v4517_v55, 0.0  ;;  %v3116_v59 = vmul.f32 0.1, %v4517_v55 }
 0x440   : > { %vm3111_vm1 = vcmp.gt.f32.partialorder %v4518_v57, 0.0  ;;  %v3115_v61 = vmul.f32 0.1, %v4518_v57  ;;  %v4230_v62 = vpop.f32.mrb[10].mxu1 }
 0x441   : > { %v3120_v0 = vsel %vm3112_vm0, %v4517_v55, %v3116_v59  ;;  %v4519_v1 = vadd.f32 %v4230_v62, %v2483_v60  ;;  %v3101_v2 = vpop.f32.mrb[11].mxu1 }
 0x442   : > { %v3137_v3 = vand.u32 4294901760, %v3120_v0  ;;  %v3119_v4 = vsel %vm3111_vm1, %v4518_v57, %v3115_v61  ;;  %v4520_v8 = vadd.f32 %v3101_v2, %v2478_v63 }
 0x443   : > { %v3134_v10 = vand.u32 4294901760, %v3119_v4  ;;  %vm3114_vm2 = vcmp.gt.f32.partialorder %v4519_v1, 0.0  ;;  %v3118_v11 = vmul.f32 0.1, %v4519_v1 }
 0x444   : > { %v3221_v12 = vsub.f32 %v3120_v0, %v3137_v3  ;;  %vm3113_vm3 = vcmp.gt.f32.partialorder %v4520_v8, 0.0  ;;  %v3117_v13 = vmul.f32 0.1, %v4520_v8 }
 0x445   : > { %v3214_v14 = vsub.f32 %v3119_v4, %v3134_v10  ;;  %v3122_v15 = vsel %vm3114_vm2, %v4519_v1, %v3118_v11  ;;  %v4466_v16 = vpack.c.bf16 %v3137_v3, %v3134_v10 }
 0x446   : > { %v3222_v17 = vand.u32 4294901760, %v3221_v12  ;;  %v3143_v18 = vand.u32 4294901760, %v3122_v15  ;;  %v3121_v19 = vsel %vm3113_vm3, %v4520_v8, %v3117_v13 }
 0x447   : > { %v3215_v21 = vand.u32 4294901760, %v3214_v14  ;;  %v3140_v23 = vand.u32 4294901760, %v3121_v19  ;;  %4467 = vmatpush3.bf16.msra.mxu1 %v4466_v16  ;;  %v4478_v24 = vpack.c.bf16 %v3221_v12, %v3214_v14 }
 0x448   : > { %v3235_v25 = vsub.f32 %v3122_v15, %v3143_v18  ;;  %4468 = vmatprep.subr.bf16.mxu1 %v4666_v41  ;;  %v3223_v27 = vsub.f32 %v3221_v12, %v3222_v17 }
 0x449   : > { %v3228_v6 = vsub.f32 %v3121_v19, %v3140_v23  ;;  %v4469_v7 = vpack.c.bf16 %v3143_v18, %v3140_v23  ;;  %v3216_v5 = vsub.f32 %v3214_v14, %v3215_v21  ;;  %v4490_v22 = vpack.c.bf16 %v3222_v17, %v3215_v21 }
 0x44a   : > { %v3236_v26 = vand.u32 4294901760, %v3235_v25  ;;  %v3224_v32 = vand.u32 4294901760, %v3223_v27 }
 0x44b   : > { %v3229_v33 = vand.u32 4294901760, %v3228_v6  ;;  %4470 = vmatpush3.bf16.msra.mxu1 %v4469_v7  ;;  %v3217_v34 = vand.u32 4294901760, %v3216_v5  ;;  %v4481_v35 = vpack.c.bf16 %v3235_v25, %v3228_v6 }
 0x44c   : > { %v3237_v37 = vsub.f32 %v3235_v25, %v3236_v26 }
 0x44d   : > { %v4472_v38 = vpack.c.bf16 %v3224_v32, %v3217_v34  ;;  %v3230_v29 = vsub.f32 %v3228_v6, %v3229_v33  ;;  %v4493_v30 = vpack.c.bf16 %v3236_v26, %v3229_v33 }
 0x44e   : > { %4240 = vmatmul.mubr.f32.vlgmr.msra.gmra.mrb[12].mxu1 %v3206_v31  ;;  %v3238_v28 = vand.u32 4294901760, %v3237_v37 }
 0x44f   : > { %4473 = vmatpush3.bf16.msra.mxu0 %v4472_v38  ;;  %v3231_v36 = vand.u32 4294901760, %v3230_v29 }
 0x450   : > { %4474 = vmatprep.subr.bf16.mxu0 %v4666_v41 }
 0x451   : > { %v4475_v39 = vpack.c.bf16 %v3238_v28, %v3231_v36 }
 0x453   : > { %4476 = vmatpush3.bf16.msra.mxu0 %v4475_v39 }
 0x454   : > { %4477 = vmatprep.subr.bf16.mxu0 %v4666_v41 }
 0x456   : > { %4251 = vmatmul.mubr.f32.vlgmr.msra.gmra.mrb[8].mxu0 %v5143_v52 }
 0x457   : > { %4479 = vmatpush3.bf16.msra.mxu0 %v4478_v24  ;;  %4261 = vmatprep.mubr.msk.f32.mxu0 %vm4667_vm15, %v4668_v42 }
 0x458   : > { %4480 = vmatprep.subr.bf16.mxu0 %v4666_v41 }
 0x45b   : > { %4482 = vmatpush3.bf16.msra.mxu0 %v4481_v35 }
 0x45c   : > { %4483 = vmatprep.subr.bf16.mxu0 %v4666_v41 }
 0x45e   : > { %4262 = vmatmul.mubr.f32.vlgmr.msra.gmra.mrb[8].mxu0 %v5146_v58 }
 0x45f   : > { %4485 = vmatpush3.bf16.msra.mxu0 %v4466_v16  ;;  %4272 = vmatprep.mubr.msk.f32.mxu0 %vm4667_vm15, %v4668_v42 }
 0x460   : > { %4486 = vmatprep.subr.bf16.mxu0 %v4666_v41 }
 0x463   : > { %4488 = vmatpush3.bf16.msra.mxu0 %v4469_v7 }
 0x464   : > { %4489 = vmatprep.subr.bf16.mxu0 %v4666_v41 }
 0x466   : > { %4273 = vmatmul.mubr.f32.vlgmr.msra.gmra.mrb[8].mxu0 %v3204_v9 }
 0x467   : > { %4491 = vmatpush3.bf16.msra.mxu0 %v4490_v22  ;;  %4283 = vmatprep.mubr.msk.f32.mxu0 %vm4667_vm15, %v4668_v42 }
 0x468   : > { %4492 = vmatprep.subr.bf16.mxu0 %v4666_v41 }
 0x46b   : > { %4494 = vmatpush3.bf16.msra.mxu0 %v4493_v30 }
 0x46c   : > { %4495 = vmatprep.subr.bf16.mxu0 %v4666_v41 }
 0x46e   : > { %4284 = vmatmul.mubr.f32.vlgmr.msra.gmra.mrb[8].mxu0 %v5143_v52 }
 0x46f   : > { %4497 = vmatpush3.bf16.msra.mxu0 %v4466_v16  ;;  %4294 = vmatprep.mubr.msk.f32.mxu0 %vm4667_vm15, %v4668_v42  ;;  %v3628_v42 = vpop.permute.xlu1 %3627 }
 0x470   : > { %4498 = vmatprep.subr.bf16.mxu0 %v4666_v41 }
 0x473   : > { %4500 = vmatpush3.bf16.msra.mxu0 %v4469_v7 }
 0x476   : > { %4295 = vmatmul.mubr.f32.vlgmr.msra.gmra.mrb[8].mxu0 %v5143_v52 }
 0x521   : > { %v3208_v43 = vpop.f32.mrb[12].mxu1 }
 0x522   : > { %v4241_v44 = vpop.f32.mrb[13].mxu1  ;;  %v3209_v46 = vadd.f32 %v3208_v43, %v3128_v45 }
 0x549   : > { %v3614_v47 = vpop.f32.mrb[8].mxu0 }
 0x54a   : > { %v4522_v49 = vadd.f32 %v3614_v47, %v3209_v46  ;;  %v4296_v50 = vpop.f32.mrb[9].mxu0 }
 0x54c   : > { %v3618_v40 = vsub.f32 0.0, %v4522_v49 }
 0x54e   : > { %v3619_v48 = vmul.f32 1.442695, %v3618_v40 }
 0x550   : > { %4637 = vpow2.f32 %v3619_v48 }
 0x55a   : > { %v4638_v51 = vpop.eup %4637 }
 0x55b   : > { %v3621_v53 = vadd.f32 1.0, %v4638_v51 }
 0x55d   : > { %4639 = vrcp.f32 %v3621_v53 }
 0x567   : > { %v4640_v41 = vpop.eup %4639 }
 0x568   : > { %v3630_v52 = vmul.f32 %v4640_v41, %v3628_v42 }
 0x56a   : > { %v3637_v55 = vadd.f32 %v3635_v54, %v3630_v52 }
 0x56c   : > { %3638 = vst [vmem:[%s476_s18] sm:$0xf] %v3637_v55 }
 0x56d PF: > { %p20_p9 = scmp.ge.s32.totalorder %s4756_s29, 5   ;;  %s5203_s25 = smov %s4659_s26 }
 0x56e   : > { %s5204_s26 = smov %s4765_s15  ;;  %s5205_s27 = smov %s4756_s29 }
 0x56f   :  { %22 = sbr.rel (!%p20_p9) target bundleno = 2 (0x2), region = 145 }

</bundles_post_ra>
